<compile_context>
chip_gen: v5e
topology: v5e:2x2
jax: 0.10.0
libtpu: 0.0.40
codegen_flags: <defaults>
</compile_context>

<pallas_src>
import functools
import math

import jax
import jax.numpy as jnp
from jax import lax
from jax.experimental import pallas as pl
from jax.experimental.pallas import tpu as pltpu


def _round_up(x, m):
    return ((x + m - 1) // m) * m


def _softplus(x):
    # Numerically stable softplus: max(x, 0) + log1p(exp(-|x|)). Pure VPU/EUP elementwise ops.
    return jnp.maximum(x, 0.0) + jnp.log1p(jnp.exp(-jnp.abs(x)))


# ----------------------------- kernels -----------------------------------------------------


def _bayes_linear_train_kernel(x_ref, wmu_ref, wrho_ref, eps_w_ref,
                               bmu_ref, brho_ref, eps_b_ref,
                               o_ref, acc_ref, *, use_bf16_matmul):
    k = pl.program_id(1)

    @pl.when(k == 0)
    def _():
        acc_ref[...] = jnp.zeros_like(acc_ref)

    # Reparameterization: this (tn, tk) weight tile is sampled exactly once per forward
    # (the grid has no batch axis), keeping softplus (EUP) work at O(out*in).
    w_sigma = _softplus(wrho_ref[...])                            # f32 sampling math
    weight = wmu_ref[...] + w_sigma * eps_w_ref[...]              # (tn, tk)

    x_tile = x_ref[...]
    if use_bf16_matmul:
        x_tile = x_tile.astype(jnp.bfloat16)
        weight = weight.astype(jnp.bfloat16)

    # x @ W^T expressed directly as a contraction over the shared in_features (last) axis:
    # the MXU consumes the sampled weight tile in its native layout (no transpose/relayout).
    acc_ref[...] += lax.dot_general(
        x_tile, weight,
        dimension_numbers=(((1,), (1,)), ((), ())),
        preferred_element_type=jnp.float32)

    @pl.when(k == pl.num_programs(1) - 1)
    def _():
        # Bias sampling + add only once per output tile, at the final reduction step.
        bias = bmu_ref[...] + _softplus(brho_ref[...]) * eps_b_ref[...]   # (1, tn)
        o_ref[...] = (acc_ref[...] + bias).astype(o_ref.dtype)


def _bayes_linear_eval_kernel(x_ref, wmu_ref, bmu_ref, o_ref, acc_ref, *, use_bf16_matmul):
    k = pl.program_id(1)

    @pl.when(k == 0)
    def _():
        acc_ref[...] = jnp.zeros_like(acc_ref)

    x_tile = x_ref[...]
    w_tile = wmu_ref[...]
    if use_bf16_matmul:
        x_tile = x_tile.astype(jnp.bfloat16)
        w_tile = w_tile.astype(jnp.bfloat16)

    acc_ref[...] += lax.dot_general(
        x_tile, w_tile,
        dimension_numbers=(((1,), (1,)), ((), ())),
        preferred_element_type=jnp.float32)

    @pl.when(k == pl.num_programs(1) - 1)
    def _():
        o_ref[...] = (acc_ref[...] + bmu_ref[...]).astype(o_ref.dtype)


# ----------------------------- wrapper ------------------------------------------------------


def bayesian_linear_forward(x, weight_mu, weight_rho, bias_mu, bias_rho,
                            eps_w=None, eps_b=None, *, training=True,
                            tile_n=256, tile_k=256, use_bf16_matmul=False):
    """Forward pass of BayesianLinear.

    x:                  (B, in_features) float32
    weight_mu/rho/eps:  (out_features, in_features) float32
    bias_mu/rho/eps:    (out_features,) float32
    """
    B, in_f = x.shape
    out_f = weight_mu.shape[0]

    # Lane-dense padding: out/in features -> multiples of 128 (full vreg lanes, unmasked
    # stores, full MXU tiles); batch -> multiple of 8 (sublane).
    K_pad = _round_up(in_f, 128)
    N_pad = _round_up(out_f, 128)
    tk = min(tile_k, K_pad)
    tn = min(tile_n, N_pad)
    K_pad = _round_up(K_pad, tk)
    N_pad = _round_up(N_pad, tn)
    B_pad = _round_up(B, 8)

    # Zero padding keeps the math exact: padded mu == 0 and padded eps == 0, so the sampled
    # padded weights/bias are exactly 0 and padded x columns contribute nothing to the dot.
    x_p = jnp.pad(x, ((0, B_pad - B), (0, K_pad - in_f)))
    wmu_p = jnp.pad(weight_mu, ((0, N_pad - out_f), (0, K_pad - in_f)))
    bmu_p = jnp.pad(bias_mu, (0, N_pad - out_f)).reshape(1, N_pad)

    grid = (N_pad // tn, K_pad // tk)           # reduction axis (k) last

    x_spec = pl.BlockSpec((B_pad, tk), lambda n, k: (0, k))
    w_spec = pl.BlockSpec((tn, tk), lambda n, k: (n, k))
    b_spec = pl.BlockSpec((1, tn), lambda n, k: (0, n))
    o_spec = pl.BlockSpec((B_pad, tn), lambda n, k: (0, n))

    # Scoped-VMEM budget derived from the chosen tiles (double-buffered I/O + accumulator),
    # capped at 64 MiB so it is safe on v7x (64 MiB physical VMEM) as well as v5e/v6e.
    n_w_streams = 3 if training else 1
    n_b_streams = 3 if training else 1
    block_bytes = 4 * (B_pad * tk + n_w_streams * tn * tk + n_b_streams * tn + B_pad * tn)
    scratch_bytes = 4 * B_pad * tn
    vmem_limit = int(min(max(4 * block_bytes + scratch_bytes, 32 << 20), 64 << 20))

    cparams = pltpu.CompilerParams(
        dimension_semantics=("parallel", "arbitrary"),
        vmem_limit_bytes=vmem_limit)

    if training:
        if eps_w is None or eps_b is None:
            raise ValueError("training=True requires eps_w and eps_b")
        wrho_p = jnp.pad(weight_rho, ((0, N_pad - out_f), (0, K_pad - in_f)))
        eps_w_p = jnp.pad(eps_w, ((0, N_pad - out_f), (0, K_pad - in_f)))
        brho_p = jnp.pad(bias_rho, (0, N_pad - out_f)).reshape(1, N_pad)
        eps_b_p = jnp.pad(eps_b, (0, N_pad - out_f)).reshape(1, N_pad)

        kernel = functools.partial(_bayes_linear_train_kernel,
                                   use_bf16_matmul=use_bf16_matmul)
        out_p = pl.pallas_call(
            kernel,
            out_shape=jax.ShapeDtypeStruct((B_pad, N_pad), x.dtype),
            grid_spec=pltpu.PrefetchScalarGridSpec(
                num_scalar_prefetch=0,
                grid=grid,
                in_specs=[x_spec, w_spec, w_spec, w_spec, b_spec, b_spec, b_spec],
                out_specs=o_spec,
                scratch_shapes=[pltpu.VMEM((B_pad, tn), jnp.float32)]),
            compiler_params=cparams,
        )(x_p, wmu_p, wrho_p, eps_w_p, bmu_p, brho_p, eps_b_p)
    else:
        # Eval path: mean weights only — no rho/eps HBM streams, no softplus work.
        kernel = functools.partial(_bayes_linear_eval_kernel,
                                   use_bf16_matmul=use_bf16_matmul)
        out_p = pl.pallas_call(
            kernel,
            out_shape=jax.ShapeDtypeStruct((B_pad, N_pad), x.dtype),
            grid_spec=pltpu.PrefetchScalarGridSpec(
                num_scalar_prefetch=0,
                grid=grid,
                in_specs=[x_spec, w_spec, b_spec],
                out_specs=o_spec,
                scratch_shapes=[pltpu.VMEM((B_pad, tn), jnp.float32)]),
            compiler_params=cparams,
        )(x_p, wmu_p, bmu_p)

    return out_p[:B, :out_f]


# ----------------------------- init + self-test ---------------------------------------------


def init_params(key, in_features, out_features):
    """Deterministic init mirroring BayesianLinear.reset_parameters()."""
    k_w, k_b = jax.random.split(key)
    bound = 1.0 / math.sqrt(in_features)
    weight_mu = jax.random.uniform(
        k_w, (out_features, in_features), jnp.float32, -bound, bound)
    weight_rho = jnp.full((out_features, in_features), -3.0, jnp.float32)
    bias_mu = jax.random.uniform(k_b, (out_features,), jnp.float32, -bound, bound)
    bias_rho = jnp.full((out_features,), -3.0, jnp.float32)
    return weight_mu, weight_rho, bias_mu, bias_rho


if __name__ == "__main__":
    in_features, out_features, batch = 32, 16, 8

    key = jax.random.PRNGKey(0)
    k_params, k_x, k_ew, k_eb = jax.random.split(key, 4)

    weight_mu, weight_rho, bias_mu, bias_rho = init_params(
        k_params, in_features, out_features)

    x = jax.random.normal(k_x, (batch, in_features), jnp.float32)
    # epsilon ~ N(0,1) (torch.randn_like) generated as glue; sampling math is in-kernel.
    eps_w = jax.random.normal(k_ew, (out_features, in_features), jnp.float32)
    eps_b = jax.random.normal(k_eb, (out_features,), jnp.float32)

    # Training path (reparameterized sampling).
    out_train = bayesian_linear_forward(
        x, weight_mu, weight_rho, bias_mu, bias_rho, eps_w, eps_b, training=True)
    out_train = jax.block_until_ready(out_train)

    w = weight_mu + jax.nn.softplus(weight_rho) * eps_w
    b = bias_mu + jax.nn.softplus(bias_rho) * eps_b
    ref_train = x @ w.T + b
    assert out_train.shape == (batch, out_features)
    assert jnp.allclose(out_train, ref_train, atol=1e-5, rtol=1e-5)

    # Eval path (mean weights only).
    out_eval = bayesian_linear_forward(
        x, weight_mu, weight_rho, bias_mu, bias_rho, training=False)
    out_eval = jax.block_until_ready(out_eval)
    ref_eval = x @ weight_mu.T + bias_mu
    assert jnp.allclose(out_eval, ref_eval, atol=1e-5, rtol=1e-5)

    print("KERNEL_OK")
</pallas_src>

<mosaic_0001>
module attributes {stable_mosaic.version = 11 : i64} {
  func.func @_bayes_linear_train_kernel(%arg0: i32, %arg1: i32, %arg2: memref<8x128xf32, #tpu.memory_space<vmem>>, %arg3: memref<128x128xf32, #tpu.memory_space<vmem>>, %arg4: memref<128x128xf32, #tpu.memory_space<vmem>>, %arg5: memref<128x128xf32, #tpu.memory_space<vmem>>, %arg6: memref<1x128xf32, #tpu.memory_space<vmem>>, %arg7: memref<1x128xf32, #tpu.memory_space<vmem>>, %arg8: memref<1x128xf32, #tpu.memory_space<vmem>>, %arg9: memref<8x128xf32, #tpu.memory_space<vmem>>, %arg10: memref<8x128xf32, #tpu.memory_space<vmem>>) attributes {dimension_semantics = [#tpu.dimension_semantics<parallel>, #tpu.dimension_semantics<arbitrary>], iteration_bounds = array<i64: 1, 1>, scalar_prefetch = 0 : i64, scratch_operands = 1 : i64, tpu.core_type = #tpu.core_type<tc>, window_params = [{transform_indices = @transform_0, window_bounds = array<i64: 8, 128>}, {transform_indices = @transform_1, window_bounds = array<i64: 128, 128>}, {transform_indices = @transform_2, window_bounds = array<i64: 128, 128>}, {transform_indices = @transform_3, window_bounds = array<i64: 128, 128>}, {transform_indices = @transform_4, window_bounds = array<i64: 1, 128>}, {transform_indices = @transform_5, window_bounds = array<i64: 1, 128>}, {transform_indices = @transform_6, window_bounds = array<i64: 1, 128>}, {transform_indices = @transform_7, window_bounds = array<i64: 8, 128>}]} {
    %c0_i32 = arith.constant 0 : i32
    %0 = arith.cmpi eq, %arg1, %c0_i32 : i32
    %1 = arith.extui %0 : i1 to i32
    %c0_i32_0 = arith.constant 0 : i32
    %2 = arith.cmpi ne, %1, %c0_i32_0 : i32
    scf.if %2 {
      %cst_16 = arith.constant 0.000000e+00 : f32
      %24 = vector.broadcast %cst_16 : f32 to vector<8x128xf32>
      %c0_17 = arith.constant 0 : index
      %c0_18 = arith.constant 0 : index
      %25 = vector.load %arg10[%c0_17, %c0_18] : memref<8x128xf32, #tpu.memory_space<vmem>>, vector<8x128xf32>
      tpu.vector_store %arg10[%c0_17, %c0_18], %24 {strides = array<i32>} : memref<8x128xf32, #tpu.memory_space<vmem>>, vector<8x128xf32>,
    } else {
    }
    %c0 = arith.constant 0 : index
    %c0_1 = arith.constant 0 : index
    %3 = vector.load %arg4[%c0, %c0_1] : memref<128x128xf32, #tpu.memory_space<vmem>>, vector<128x128xf32>
    %cst = arith.constant 0.000000e+00 : f32
    %4 = vector.broadcast %cst : f32 to vector<128x128xf32>
    %5 = arith.maximumf %3, %4 : vector<128x128xf32>
    %6 = math.absf %3 : vector<128x128xf32>
    %cst_2 = arith.constant 0.000000e+00 : f32
    %7 = vector.broadcast %cst_2 : f32 to vector<128x128xf32>
    %8 = arith.subf %7, %6 : vector<128x128xf32>
    %9 = math.exp %8 : vector<128x128xf32>
    %10 = math.log1p %9 : vector<128x128xf32>
    %11 = arith.addf %5, %10 : vector<128x128xf32>
    %c0_3 = arith.constant 0 : index
    %c0_4 = arith.constant 0 : index
    %12 = vector.load %arg3[%c0_3, %c0_4] : memref<128x128xf32, #tpu.memory_space<vmem>>, vector<128x128xf32>
    %c0_5 = arith.constant 0 : index
    %c0_6 = arith.constant 0 : index
    %13 = vector.load %arg5[%c0_5, %c0_6] : memref<128x128xf32, #tpu.memory_space<vmem>>, vector<128x128xf32>
    %14 = arith.mulf %11, %13 : vector<128x128xf32>
    %15 = arith.addf %12, %14 : vector<128x128xf32>
    %c0_7 = arith.constant 0 : index
    %c0_8 = arith.constant 0 : index
    %16 = vector.load %arg2[%c0_7, %c0_8] : memref<8x128xf32, #tpu.memory_space<vmem>>, vector<8x128xf32>
    %c0_9 = arith.constant 0 : index
    %c0_10 = arith.constant 0 : index
    %17 = vector.load %arg10[%c0_9, %c0_10] : memref<8x128xf32, #tpu.memory_space<vmem>>, vector<8x128xf32>
    %cst_11 = arith.constant dense<0.000000e+00> : vector<8x128xf32>
    %18 = tpu.matmul %16, %15, %cst_11 {dimension_numbers = #tpu.dot_dimension_numbers<[1], [1], [0], [0], [0, 0, 1, 0], [], []>} : vector<8x128xf32>, vector<128x128xf32>, vector<8x128xf32> -> vector<8x128xf32>
    %19 = arith.addf %17, %18 : vector<8x128xf32>
    %c0_12 = arith.constant 0 : index
    %c0_13 = arith.constant 0 : index
    %20 = vector.load %arg10[%c0_12, %c0_13] : memref<8x128xf32, #tpu.memory_space<vmem>>, vector<8x128xf32>
    tpu.vector_store %arg10[%c0_12, %c0_13], %19 {strides = array<i32>} : memref<8x128xf32, #tpu.memory_space<vmem>>, vector<8x128xf32>,
    %c0_i32_14 = arith.constant 0 : i32
    %21 = arith.cmpi eq, %arg1, %c0_i32_14 : i32
    %22 = arith.extui %21 : i1 to i32
    %c0_i32_15 = arith.constant 0 : i32
    %23 = arith.cmpi ne, %22, %c0_i32_15 : i32
    scf.if %23 {
      %c0_16 = arith.constant 0 : index
      %c0_17 = arith.constant 0 : index
      %24 = vector.load %arg6[%c0_16, %c0_17] : memref<1x128xf32, #tpu.memory_space<vmem>>, vector<1x128xf32>
      %c0_18 = arith.constant 0 : index
      %c0_19 = arith.constant 0 : index
      %25 = vector.load %arg7[%c0_18, %c0_19] : memref<1x128xf32, #tpu.memory_space<vmem>>, vector<1x128xf32>
      %cst_20 = arith.constant 0.000000e+00 : f32
      %26 = vector.broadcast %cst_20 : f32 to vector<1x128xf32>
      %27 = arith.maximumf %25, %26 : vector<1x128xf32>
      %28 = math.absf %25 : vector<1x128xf32>
      %cst_21 = arith.constant 0.000000e+00 : f32
      %29 = vector.broadcast %cst_21 : f32 to vector<1x128xf32>
      %30 = arith.subf %29, %28 : vector<1x128xf32>
      %31 = math.exp %30 : vector<1x128xf32>
      %32 = math.log1p %31 : vector<1x128xf32>
      %33 = arith.addf %27, %32 : vector<1x128xf32>
      %c0_22 = arith.constant 0 : index
      %c0_23 = arith.constant 0 : index
      %34 = vector.load %arg8[%c0_22, %c0_23] : memref<1x128xf32, #tpu.memory_space<vmem>>, vector<1x128xf32>
      %35 = arith.mulf %33, %34 : vector<1x128xf32>
      %36 = arith.addf %24, %35 : vector<1x128xf32>
      %c0_24 = arith.constant 0 : index
      %c0_25 = arith.constant 0 : index
      %37 = vector.load %arg10[%c0_24, %c0_25] : memref<8x128xf32, #tpu.memory_space<vmem>>, vector<8x128xf32>
      %38 = vector.broadcast %36 : vector<1x128xf32> to vector<8x128xf32>
      %39 = arith.addf %37, %38 : vector<8x128xf32>
      %c0_26 = arith.constant 0 : index
      %c0_27 = arith.constant 0 : index
      %40 = vector.load %arg9[%c0_26, %c0_27] : memref<8x128xf32, #tpu.memory_space<vmem>>, vector<8x128xf32>
      tpu.vector_store %arg9[%c0_26, %c0_27], %39 {strides = array<i32>} : memref<8x128xf32, #tpu.memory_space<vmem>>, vector<8x128xf32>,
    } else {
    }
    return
  }
  func.func @transform_0(%arg0: i32, %arg1: i32) -> (i32, i32) {
    %c0_i32 = arith.constant 0 : i32
    %c0_i32_0 = arith.constant 0 : i32
    return %c0_i32, %arg1 : i32, i32
  }
  func.func @transform_1(%arg0: i32, %arg1: i32) -> (i32, i32) {
    %c0_i32 = arith.constant 0 : i32
    return %arg0, %arg1 : i32, i32
  }
  func.func @transform_2(%arg0: i32, %arg1: i32) -> (i32, i32) {
    %c0_i32 = arith.constant 0 : i32
    return %arg0, %arg1 : i32, i32
  }
  func.func @transform_3(%arg0: i32, %arg1: i32) -> (i32, i32) {
    %c0_i32 = arith.constant 0 : i32
    return %arg0, %arg1 : i32, i32
  }
  func.func @transform_4(%arg0: i32, %arg1: i32) -> (i32, i32) {
    %c0_i32 = arith.constant 0 : i32
    %c0_i32_0 = arith.constant 0 : i32
    return %c0_i32, %arg0 : i32, i32
  }
  func.func @transform_5(%arg0: i32, %arg1: i32) -> (i32, i32) {
    %c0_i32 = arith.constant 0 : i32
    %c0_i32_0 = arith.constant 0 : i32
    return %c0_i32, %arg0 : i32, i32
  }
  func.func @transform_6(%arg0: i32, %arg1: i32) -> (i32, i32) {
    %c0_i32 = arith.constant 0 : i32
    %c0_i32_0 = arith.constant 0 : i32
    return %c0_i32, %arg0 : i32, i32
  }
  func.func @transform_7(%arg0: i32, %arg1: i32) -> (i32, i32) {
    %c0_i32 = arith.constant 0 : i32
    %c0_i32_0 = arith.constant 0 : i32
    return %c0_i32, %arg0 : i32, i32
  }
}

</mosaic_0001>

<bundles_post_ra>
// kernel: tpu_custom_call.1
= control target key start
LH: loop header
LB: loop body
LE: loop exit
PB: predicated region body
PF: predicated region fallthrough
CT: control target
= control target key end

     0   :  { %12 = vsyncpa [#allocation4], 0  ;;  %s952_s0 = inlined_call_operand.hbm [shape: f32[8,128], index: 0, kind: input, shape index: {}]   ;;  %s953_s1 = inlined_call_operand.hbm [shape: f32[128,128], index: 1, kind: input, shape index: {}]   ;;  %s954_s2 = inlined_call_operand.hbm [shape: f32[128,128], index: 2, kind: input, shape index: {}]   ;;  %s955_s3 = inlined_call_operand.hbm [shape: f32[128,128], index: 3, kind: input, shape index: {}]   ;;  %s956_s4 = inlined_call_operand.vmem [shape: f32[1,128], index: 4, kind: input, shape index: {}]   ;;  %s957_s5 = inlined_call_operand.vmem [shape: f32[1,128], index: 5, kind: input, shape index: {}]   ;;  %s958_s6 = inlined_call_operand.vmem [shape: f32[1,128], index: 6, kind: input, shape index: {}]   ;;  %s959_s7 = inlined_call_operand.hbm [shape: f32[8,128], index: 7, kind: output, shape index: {}]  }
   0x1   :  { %13 = vsyncpa [#allocation7], 0 }
   0x2   :  { %14 = vsyncpa [#allocation10], 0  ;;  %s31_s26 = sshll.u32 %s953_s1, 4  ;;  %s32_s26 = int_to_ptr.hbm [resolvable:$true] %s31_s26 }
   0x3   :  { %15 = vsyncpa [#allocation5], 0  ;;  %s688_s27 = smov [#allocation6]   ;;  %s21_s8 = sshll.u32 %s952_s0, 4  ;;  %s22_s8 = int_to_ptr.hbm [resolvable:$true] %s21_s8 }
   0x4   :  { %s33_s28 = sshll.u32 %s688_s27, 4  ;;  %s689_s9 = smov 128   ;;  %s34_s28 = int_to_ptr.vmem [resolvable:$true] %s33_s28 }
   0x5   :  { %s690_s10 = smov 8   ;;  %s691_s11 = smov [#allocation3]  }
   0x6   :  { %39 = dma.hbm_to_vmem [thread:$0]  %s32_s26, 2048, %s34_s28, [#allocation7], %s689_s9, %s689_s9, %s690_s10  }
   0x7   :  { %s23_s12 = sshll.u32 %s691_s11, 4  ;;  %s44_s15 = sshll.u32 %s954_s2, 4  ;;  %s24_s12 = int_to_ptr.vmem [resolvable:$true] %s23_s12  ;;  %s45_s15 = int_to_ptr.hbm [resolvable:$true] %s44_s15 }
   0x8   :  { %26 = dma.hbm_to_vmem [thread:$0]  %s22_s8, 128, %s24_s12, [#allocation4]  }
   0x9   :  { %s57_s17 = sshll.u32 %s955_s3, 4  ;;  %s692_s18 = smov [#allocation8]   ;;  %s58_s17 = int_to_ptr.hbm [resolvable:$true] %s57_s17 }
   0xa   :  { %s46_s19 = sshll.u32 %s692_s18, 4  ;;  %s693_s0 = smov [#allocation9]   ;;  %s47_s19 = int_to_ptr.vmem [resolvable:$true] %s46_s19 }
   0xb   :  { %52 = dma.hbm_to_vmem [thread:$0]  %s45_s15, 2048, %s47_s19, [#allocation7], %s689_s9, %s689_s9, %s690_s10  }
   0xc   :  { %s59_s20 = sshll.u32 %s693_s0, 4  ;;  %s60_s20 = int_to_ptr.vmem [resolvable:$true] %s59_s20 }
   0xd   :  { %65 = dma.hbm_to_vmem [thread:$0]  %s58_s17, 2048, %s60_s20, [#allocation10], %s689_s9, %s689_s9, %s690_s10  }
   0xe   :  { %680 = dma.done.wait [#allocation4], 128  }
   0xf   :  { %681 = vsyncadd [#allocation4], 4294967168 }
  0x10   :  { %682 = dma.done.wait [#allocation7], 4096  }
  0x11   :  { %683 = vsyncadd [#allocation7], 4294963200 }
  0x12   :  { %684 = dma.done.wait [#allocation10], 2048  }
  0x13   :  { %685 = vsyncadd [#allocation10], 4294965248  ;;  %v747_v0 = vld [vmem:[#allocation8 + $0x78] sm:$0xff]  ;;  %v750_v2 = vld [vmem:[#allocation8 + $0x70] sm:$0xff]  ;;  %s694_s24 = smov [#allocation11]   ;;  %s473_s28 = sshll.u32 %s959_s7, 4  ;;  %s474_s28 = int_to_ptr.hbm [resolvable:$true] %s473_s28 }
  0x14   :  { %v140_v1 = vand.u32 2147483647, %v747_v0  ;;  %v139_v3 = vand.u32 2147483647, %v750_v2  ;;  %v753_v4 = vld [vmem:[#allocation8 + $0x68] sm:$0xff]  ;;  %v755_v5 = vld [vmem:[#allocation8 + $0x60] sm:$0xff] }
  0x15   :  { %v757_v6 = vld [vmem:[#allocation8 + $0x58] sm:$0xff]  ;;  %v138_v8 = vand.u32 2147483647, %v753_v4  ;;  %v760_v9 = vld [vmem:[#allocation8 + $0x50] sm:$0xff]  ;;  %v137_v11 = vand.u32 2147483647, %v755_v5 }
  0x16   :  { %v156_v7 = vsub.f32 0.0, %v140_v1  ;;  %v155_v10 = vsub.f32 0.0, %v139_v3  ;;  %v763_v12 = vld [vmem:[#allocation8 + $0x48] sm:$0xff]  ;;  %v136_v15 = vand.u32 2147483647, %v757_v6  ;;  %v767_v19 = vld [vmem:[#allocation8 + $0x40] sm:$0xff] }
  0x17   :  { %v154_v14 = vsub.f32 0.0, %v138_v8  ;;  %v153_v17 = vsub.f32 0.0, %v137_v11  ;;  %v135_v18 = vand.u32 2147483647, %v760_v9  ;;  %v134_v22 = vand.u32 2147483647, %v763_v12 }
  0x18   :  { %v187_v13 = vmul.f32 1.442695, %v156_v7  ;;  %v185_v16 = vmul.f32 1.442695, %v155_v10  ;;  %v152_v21 = vsub.f32 0.0, %v136_v15  ;;  %v771_v31 = vld [vmem:[#allocation8 + $0x38] sm:$0xff] }
  0x19   :  { %v183_v20 = vmul.f32 1.442695, %v154_v14  ;;  %v181_v23 = vmul.f32 1.442695, %v153_v17  ;;  %v151_v24 = vsub.f32 0.0, %v135_v18  ;;  %v150_v26 = vsub.f32 0.0, %v134_v22 }
  0x1a   :  { %492 = vpow2.f32 %v187_v13  ;;  %v179_v25 = vmul.f32 1.442695, %v152_v21  ;;  %v133_v27 = vand.u32 2147483647, %v767_v19  ;;  %v124_v32 = vmax.f32 %v747_v0, 0.0  ;;  %v777_v38 = vld [vmem:[#allocation8 + $0x30] sm:$0xff] }
  0x1b   :  { %494 = vpow2.f32 %v185_v16  ;;  %v177_v28 = vmul.f32 1.442695, %v151_v24  ;;  %v175_v29 = vmul.f32 1.442695, %v150_v26  ;;  %v123_v33 = vmax.f32 %v750_v2, 0.0  ;;  %v363_v59 = vld [vmem:[#allocation6 + $0x70] sm:$0xff] }
  0x1c   :  { %496 = vpow2.f32 %v183_v20  ;;  %v149_v30 = vsub.f32 0.0, %v133_v27  ;;  %v122_v35 = vmax.f32 %v753_v4, 0.0  ;;  %v121_v36 = vmax.f32 %v755_v5, 0.0  ;;  %s471_s25 = sshll.u32 %s694_s24, 4  ;;  %s472_s25 = int_to_ptr.vmem [resolvable:$true] %s471_s25 }
  0x1d   :  { %498 = vpow2.f32 %v181_v23  ;;  %v132_v42 = vand.u32 2147483647, %v771_v31  ;;  %v120_v49 = vmax.f32 %v757_v6, 0.0  ;;  %v131_v50 = vand.u32 2147483647, %v777_v38 }
  0x1e   :  { %500 = vpow2.f32 %v179_v25  ;;  %v173_v37 = vmul.f32 1.442695, %v149_v30  ;;  %v380_v30 = vld [vmem:[#allocation9 + $0x78] sm:$0xff] }
  0x1f   :  { %502 = vpow2.f32 %v177_v28  ;;  %v782_v57 = vsub.f32 0.0, %v132_v42 }
  0x20   :  { %v493_v34 = vpop.eup %492  ;;  %504 = vpow2.f32 %v175_v29 }
  0x21   :  { %v495_v39 = vpop.eup %494  ;;  %v324_v40 = vadd.f32 1.0, %v493_v34  ;;  %v327_v41 = vmul.f32 -0.5, %v493_v34  ;;  %v330_v44 = vand.u32 2147483647, %v493_v34  ;;  %506 = vpow2.f32 %v173_v37 }
  0x22   :  { %v497_v43 = vpop.eup %496  ;;  %v315_v45 = vadd.f32 1.0, %v495_v39  ;;  %v318_v46 = vmul.f32 -0.5, %v495_v39  ;;  %v321_v55 = vand.u32 2147483647, %v495_v39 }
  0x23   :  { %v499_v47 = vpop.eup %498  ;;  %508 = vlog2.f32 %v324_v40  ;;  %v306_v48 = vadd.f32 1.0, %v497_v43  ;;  %v328_v52 = vadd.f32 1.0, %v327_v41  ;;  %v309_v54 = vmul.f32 -0.5, %v497_v43 }
  0x24   :  { %v501_v51 = vpop.eup %500  ;;  %510 = vlog2.f32 %v315_v45  ;;  %v319_v53 = vadd.f32 1.0, %v318_v46  ;;  %v297_v56 = vadd.f32 1.0, %v499_v47  ;;  %vm786_vm0 = vcmp.lt.f32.partialorder %v330_v44, 0.0004427343  ;;  %v819_v46 = vld [vmem:[#allocation8 + $0x28] sm:$0xff] }
  0x25   :  { %512 = vlog2.f32 %v306_v48  ;;  %v784_v58 = vpop.eup %502  ;;  %v310_v60 = vadd.f32 1.0, %v309_v54  ;;  %v312_v61 = vand.u32 2147483647, %v497_v43  ;;  %v300_v62 = vmul.f32 -0.5, %v499_v47 }
  0x26   :  { %v790_v63 = vpop.eup %504  ;;  %514 = vlog2.f32 %v297_v56  ;;  %v303_v1 = vand.u32 2147483647, %v499_v47  ;;  %v288_v3 = vadd.f32 1.0, %v501_v51  ;;  %v291_v7 = vmul.f32 -0.5, %v501_v51 }
  0x27   :  { %v792_v8 = vpop.eup %506  ;;  %v329_v10 = vmul.f32 %v493_v34, %v328_v52  ;;  %v320_v11 = vmul.f32 %v495_v39, %v319_v53  ;;  %v301_v13 = vadd.f32 1.0, %v300_v62  ;;  %v294_v14 = vand.u32 2147483647, %v501_v51 }
  0x28   :  { %516 = vlog2.f32 %v288_v3  ;;  %v292_v16 = vadd.f32 1.0, %v291_v7  ;;  %v279_v17 = vadd.f32 1.0, %v784_v58  ;;  %v282_v18 = vmul.f32 -0.5, %v784_v58 }
  0x29   :  { %v509_v15 = vpop.eup %508  ;;  %vm796_vm1 = vcmp.lt.f32.partialorder %v321_v55, 0.0004427343  ;;  %v311_v23 = vmul.f32 %v497_v43, %v310_v60  ;;  %vm800_vm2 = vcmp.lt.f32.partialorder %v312_v61, 0.0004427343  ;;  %v302_v27 = vmul.f32 %v499_v47, %v301_v13  ;;  %v379_v43 = vld [vmem:[#allocation9 + $0x70] sm:$0xff]  ;;  %v364_v47 = vld [vmem:[#allocation6 + $0x78] sm:$0xff] }
  0x2a   :  { %v511_v20 = vpop.eup %510  ;;  %v326_v21 = vmul.f32 0.6931472, %v509_v15  ;;  %vm804_vm3 = vcmp.lt.f32.partialorder %v303_v1, 0.0004427343  ;;  %518 = vlog2.f32 %v279_v17  ;;  %v293_v37 = vmul.f32 %v501_v51, %v292_v16  ;;  %v378_v55 = vld [vmem:[#allocation9 + $0x68] sm:$0xff] }
  0x2b   :  { %v513_v25 = vpop.eup %512  ;;  %v317_v26 = vmul.f32 0.6931472, %v511_v20  ;;  %vm810_vm4 = vcmp.lt.f32.partialorder %v294_v14, 0.0004427343  ;;  %v283_v44 = vadd.f32 1.0, %v282_v18  ;;  %v270_v45 = vadd.f32 1.0, %v790_v63 }
  0x2c   :  { %v332_v29 = vsel %vm786_vm0, %v329_v10, %v326_v21  ;;  %v308_v34 = vmul.f32 0.6931472, %v513_v25  ;;  %v515_v40 = vpop.eup %514  ;;  %v273_v0 = vmul.f32 -0.5, %v790_v63  ;;  %v285_v56 = vand.u32 2147483647, %v784_v58  ;;  %v837_v14 = vld [vmem:[#allocation8 + $0x20] sm:$0xff] }
  0x2d   :  { %v348_v41 = vadd.f32 %v332_v29, %v124_v32  ;;  %v323_v42 = vsel %vm796_vm1, %v320_v11, %v317_v26  ;;  %v299_v52 = vmul.f32 0.6931472, %v515_v40  ;;  %520 = vlog2.f32 %v270_v45  ;;  %v362_v16 = vld [vmem:[#allocation6 + $0x68] sm:$0xff]  ;;  %v377_v20 = vld [vmem:[#allocation9 + $0x60] sm:$0xff] }
  0x2e   :  { %v347_v48 = vadd.f32 %v323_v42, %v123_v33  ;;  %v314_v51 = vsel %vm800_vm2, %v311_v23, %v308_v34  ;;  %v517_v32 = vpop.eup %516  ;;  %v130_v61 = vand.u32 2147483647, %v819_v46  ;;  %v119_v3 = vmax.f32 %v760_v9, 0.0  ;;  %v361_v34 = vld [vmem:[#allocation6 + $0x60] sm:$0xff] }
  0x2f   :  { %v396_v53 = vmul.f32 %v380_v30, %v348_v41  ;;  %v346_v54 = vadd.f32 %v314_v51, %v122_v35  ;;  %v305_v2 = vsel %vm804_vm3, %v302_v27, %v299_v52  ;;  %v290_v33 = vmul.f32 0.6931472, %v517_v32  ;;  %v376_v27 = vld [vmem:[#allocation9 + $0x58] sm:$0xff] }
  0x30   :  { %v395_v60 = vmul.f32 %v379_v43, %v347_v48  ;;  %v519_v62 = vpop.eup %518  ;;  %v274_v7 = vadd.f32 1.0, %v273_v0  ;;  %v276_v4 = vand.u32 2147483647, %v790_v63  ;;  %v284_v13 = vmul.f32 %v784_v58, %v283_v44  ;;  %v360_v41 = vld [vmem:[#allocation6 + $0x58] sm:$0xff]  ;;  %v375_v48 = vld [vmem:[#allocation9 + $0x50] sm:$0xff] }
  0x31   :  { %v412_v1 = vadd.f32 %v396_v53, %v364_v47  ;;  %v394_v35 = vmul.f32 %v378_v55, %v346_v54  ;;  %v296_v10 = vsel %vm810_vm4, %v293_v37, %v290_v33  ;;  %v281_v11 = vmul.f32 0.6931472, %v519_v62  ;;  %v869_v47 = vld [vmem:[#allocation8 + $0x8] sm:$0xff] }
  0x32   :  { %v411_v15 = vadd.f32 %v395_v60, %v363_v59  ;;  %v345_v17 = vadd.f32 %v305_v2, %v121_v36  ;;  %vm841_vm5 = vcmp.lt.f32.partialorder %v285_v56, 0.0004427343  ;;  %v171_v18 = vmul.f32 1.442695, %v782_v57 }
  0x33   :  { %415 = vmatpush.xpose.msra.mxu0 %v412_v1  ;;  %v261_v21 = vadd.f32 1.0, %v792_v8  ;;  %v264_v22 = vmul.f32 -0.5, %v792_v8  ;;  %v147_v58 = vsub.f32 0.0, %v131_v50  ;;  %v146_v23 = vsub.f32 0.0, %v130_v61  ;;  %v521_v24 = vpop.eup %520  ;;  %v374_v61 = vld [vmem:[#allocation9 + $0x48] sm:$0xff] }
  0x34   :  { %v344_v5 = vadd.f32 %v296_v10, %v120_v49  ;;  %v275_v36 = vmul.f32 %v790_v63, %v274_v7  ;;  %vm853_vm6 = vcmp.lt.f32.partialorder %v276_v4, 0.0004427343  ;;  %v129_v57 = vand.u32 2147483647, %v837_v14  ;;  %v861_v49 = vld [vmem:[#allocation8 + $0x18] sm:$0xff]  ;;  %v863_v63 = vld [vmem:[#allocation8 + $0x10] sm:$0xff] }
  0x35   :  { %v410_v26 = vadd.f32 %v394_v35, %v362_v16  ;;  %v287_v28 = vsel %vm841_vm5, %v284_v13, %v281_v11  ;;  %v272_v29 = vmul.f32 0.6931472, %v521_v24  ;;  %522 = vlog2.f32 %v261_v21  ;;  %v358_v21 = vld [vmem:[#allocation6 + $0x48] sm:$0xff] }
  0x36   :  { %v393_v50 = vmul.f32 %v377_v20, %v345_v17  ;;  %v265_v30 = vadd.f32 1.0, %v264_v22  ;;  %v267_v6 = vand.u32 2147483647, %v792_v8  ;;  %524 = vpow2.f32 %v171_v18  ;;  %v884_v18 = vld [vmem:[#allocation8] sm:$0xff] }
  0x37   :  { %416 = vmatpush.xpose.msra.mxu0 %v411_v15  ;;  %v118_v37 = vmax.f32 %v763_v12, 0.0  ;;  %v117_v39 = vmax.f32 %v767_v19, 0.0  ;;  %v169_v40 = vmul.f32 1.442695, %v147_v58  ;;  %v392_v42 = vmul.f32 %v376_v27, %v344_v5  ;;  %v359_v15 = vld [vmem:[#allocation6 + $0x50] sm:$0xff] }
  0x38   :  { %v343_v43 = vadd.f32 %v287_v28, %v119_v3  ;;  %v278_v44 = vsel %vm853_vm6, %v275_v36, %v272_v29  ;;  %v167_v45 = vmul.f32 1.442695, %v146_v23  ;;  %v145_v51 = vsub.f32 0.0, %v129_v57 }
  0x39   :  { %526 = vpow2.f32 %v169_v40  ;;  %v128_v52 = vand.u32 2147483647, %v861_v49  ;;  %v127_v0 = vand.u32 2147483647, %v863_v63  ;;  %v409_v12 = vadd.f32 %v393_v50, %v361_v34 }
  0x3a   :  { %v266_v19 = vmul.f32 %v792_v8, %v265_v30  ;;  %vm874_vm7 = vcmp.lt.f32.partialorder %v267_v6, 0.0004427343  ;;  %528 = vpow2.f32 %v167_v45  ;;  %v342_v54 = vadd.f32 %v278_v44, %v118_v37 }
  0x3b   :  { %417 = vmatpush.xpose.msra.mxu0 %v410_v26  ;;  %v523_v53 = vpop.eup %522  ;;  %v165_v55 = vmul.f32 1.442695, %v145_v51  ;;  %v144_v56 = vsub.f32 0.0, %v128_v52  ;;  %v126_v59 = vand.u32 2147483647, %v869_v47  ;;  %v408_v2 = vadd.f32 %v392_v42, %v360_v41  ;;  %v373_v26 = vld [vmem:[#allocation9 + $0x40] sm:$0xff] }
  0x3c   :  { %v525_v60 = vpop.eup %524  ;;  %v391_v33 = vmul.f32 %v375_v48, %v343_v43  ;;  %v263_v62 = vmul.f32 0.6931472, %v523_v53  ;;  %v116_v1 = vmax.f32 %v771_v31, 0.0  ;;  %v143_v7 = vsub.f32 0.0, %v127_v0  ;;  %v357_v0 = vld [vmem:[#allocation6 + $0x40] sm:$0xff] }
  0x3d   :  { %v252_v3 = vadd.f32 1.0, %v525_v60  ;;  %v255_v8 = vmul.f32 -0.5, %v525_v60  ;;  %530 = vpow2.f32 %v165_v55  ;;  %v115_v35 = vmax.f32 %v777_v38, 0.0  ;;  %v355_v38 = vld [vmem:[#allocation6 + $0x30] sm:$0xff] }
  0x3e   :  { %v269_v4 = vsel %vm874_vm7, %v266_v19, %v263_v62  ;;  %v114_v10 = vmax.f32 %v819_v46, 0.0  ;;  %v163_v11 = vmul.f32 1.442695, %v144_v56  ;;  %v390_v16 = vmul.f32 %v374_v61, %v342_v54  ;;  %v372_v56 = vld [vmem:[#allocation9 + $0x38] sm:$0xff] }
  0x3f   :  { %418 = vmatpush.xpose.msra.mxu0 %v409_v12  ;;  %v527_v13 = vpop.eup %526  ;;  %532 = vlog2.f32 %v252_v3  ;;  %v256_v17 = vadd.f32 1.0, %v255_v8  ;;  %v142_v9 = vsub.f32 0.0, %v126_v59  ;;  %v258_v22 = vand.u32 2147483647, %v525_v60 }
  0x40   :  { %v529_v20 = vpop.eup %528  ;;  %v243_v58 = vadd.f32 1.0, %v527_v13  ;;  %v246_v23 = vmul.f32 -0.5, %v527_v13  ;;  %534 = vpow2.f32 %v163_v11  ;;  %v341_v24 = vadd.f32 %v269_v4, %v117_v39 }
  0x41   :  { %v234_v5 = vadd.f32 1.0, %v529_v20  ;;  %v237_v36 = vmul.f32 -0.5, %v529_v20  ;;  %v161_v25 = vmul.f32 1.442695, %v143_v7  ;;  %v407_v57 = vadd.f32 %v391_v33, %v359_v15 }
  0x42   :  { %536 = vlog2.f32 %v243_v58  ;;  %v249_v27 = vand.u32 2147483647, %v527_v13  ;;  %v125_v28 = vand.u32 2147483647, %v884_v18  ;;  %v406_v50 = vadd.f32 %v390_v16, %v358_v21 }
  0x43   :  { %419 = vmatpush.xpose.msra.mxu0 %v408_v2  ;;  %v531_v29 = vpop.eup %530  ;;  %v257_v30 = vmul.f32 %v525_v60, %v256_v17  ;;  %v247_v6 = vadd.f32 1.0, %v246_v23  ;;  %538 = vlog2.f32 %v234_v5  ;;  %v238_v34 = vadd.f32 1.0, %v237_v36  ;;  %v371_v17 = vld [vmem:[#allocation9 + $0x30] sm:$0xff] }
  0x44   :  { %v240_v37 = vand.u32 2147483647, %v529_v20  ;;  %v225_v40 = vadd.f32 1.0, %v531_v29  ;;  %v228_v41 = vmul.f32 -0.5, %v531_v29  ;;  %v389_v42 = vmul.f32 %v373_v26, %v341_v24 }
  0x45   :  { %v533_v39 = vpop.eup %532  ;;  %vm887_vm8 = vcmp.lt.f32.partialorder %v258_v22, 0.0004427343  ;;  %540 = vpow2.f32 %v161_v25  ;;  %v159_v44 = vmul.f32 1.442695, %v142_v9  ;;  %vm891_vm9 = vcmp.lt.f32.partialorder %v249_v27, 0.0004427343 }
  0x46   :  { %v535_v45 = vpop.eup %534  ;;  %v254_v48 = vmul.f32 0.6931472, %v533_v39  ;;  %542 = vlog2.f32 %v225_v40  ;;  %v231_v52 = vand.u32 2147483647, %v531_v29  ;;  %v248_v12 = vmul.f32 %v527_v13, %v247_v6  ;;  %v356_v13 = vld [vmem:[#allocation6 + $0x38] sm:$0xff]  ;;  %v354_v39 = vld [vmem:[#allocation6 + $0x28] sm:$0xff] }
  0x47   :  { %420 = vmatpush.xpose.msra.mxu0 %v407_v57  ;;  %v229_v19 = vadd.f32 1.0, %v228_v41  ;;  %v216_v32 = vadd.f32 1.0, %v535_v45  ;;  %v219_v53 = vmul.f32 -0.5, %v535_v45  ;;  %v239_v59 = vmul.f32 %v529_v20, %v238_v34 }
  0x48   :  { %v537_v54 = vpop.eup %536  ;;  %v260_v55 = vsel %vm887_vm8, %v257_v30, %v254_v48  ;;  %vm897_vm10 = vcmp.lt.f32.partialorder %v240_v37, 0.0004427343  ;;  %544 = vpow2.f32 %v159_v44  ;;  %v141_v62 = vsub.f32 0.0, %v125_v28 }
  0x49   :  { %v539_v2 = vpop.eup %538  ;;  %v340_v33 = vadd.f32 %v260_v55, %v116_v1  ;;  %v245_v61 = vmul.f32 0.6931472, %v537_v54  ;;  %546 = vlog2.f32 %v216_v32  ;;  %v405_v3 = vadd.f32 %v389_v42, %v357_v0  ;;  %v369_v42 = vld [vmem:[#allocation9 + $0x20] sm:$0xff]  ;;  %v368_v55 = vld [vmem:[#allocation9 + $0x18] sm:$0xff] }
  0x4a   :  { %v236_v8 = vmul.f32 0.6931472, %v539_v2  ;;  %vm903_vm11 = vcmp.lt.f32.partialorder %v231_v52, 0.0004427343  ;;  %v222_v4 = vand.u32 2147483647, %v535_v45  ;;  %v230_v31 = vmul.f32 %v531_v29, %v229_v19 }
  0x4b   :  { %421 = vmatpush.xpose.msra.mxu0 %v406_v50  ;;  %v541_v11 = vpop.eup %540  ;;  %v388_v15 = vmul.f32 %v372_v56, %v340_v33  ;;  %v251_v16 = vsel %vm891_vm9, %v248_v12, %v245_v61  ;;  %v220_v1 = vadd.f32 1.0, %v219_v53  ;;  %v113_v23 = vmax.f32 %v837_v14, 0.0  ;;  %v353_v54 = vld [vmem:[#allocation6 + $0x20] sm:$0xff] }
  0x4c   :  { %v543_v9 = vpop.eup %542  ;;  %v339_v20 = vadd.f32 %v251_v16, %v115_v35  ;;  %v242_v21 = vsel %vm897_vm10, %v239_v59, %v236_v8  ;;  %v207_v22 = vadd.f32 1.0, %v541_v11  ;;  %v210_v58 = vmul.f32 -0.5, %v541_v11  ;;  %v370_v35 = vld [vmem:[#allocation9 + $0x28] sm:$0xff] }
  0x4d   :  { %v227_v24 = vmul.f32 0.6931472, %v543_v9  ;;  %v157_v5 = vmul.f32 1.442695, %v141_v62  ;;  %v404_v25 = vadd.f32 %v388_v15, %v356_v13  ;;  %v338_v26 = vadd.f32 %v242_v21, %v114_v10  ;;  %v351_v9 = vld [vmem:[#allocation6 + $0x10] sm:$0xff] }
  0x4e   :  { %v545_v36 = vpop.eup %544  ;;  %v387_v57 = vmul.f32 %v371_v17, %v339_v20  ;;  %548 = vlog2.f32 %v207_v22  ;;  %v221_v29 = vmul.f32 %v535_v45, %v220_v1  ;;  %v211_v50 = vadd.f32 1.0, %v210_v58  ;;  %v366_v20 = vld [vmem:[#allocation9 + $0x8] sm:$0xff] }
  0x4f   :  { %422 = vmatpush.xpose.msra.mxu0 %v405_v3  ;;  %v547_v27 = vpop.eup %546  ;;  %v233_v28 = vsel %vm903_vm11, %v230_v31, %v227_v24  ;;  %v198_v30 = vadd.f32 1.0, %v545_v36  ;;  %vm918_vm12 = vcmp.lt.f32.partialorder %v222_v4, 0.0004427343  ;;  %v213_v34 = vand.u32 2147483647, %v541_v11  ;;  %v352_v4 = vld [vmem:[#allocation6 + $0x18] sm:$0xff] }
  0x50   :  { %v218_v14 = vmul.f32 0.6931472, %v547_v27  ;;  %v112_v37 = vmax.f32 %v861_v49, 0.0  ;;  %v201_v46 = vmul.f32 -0.5, %v545_v36  ;;  %v403_v10 = vadd.f32 %v387_v57, %v355_v38  ;;  %v349_v27 = vld [vmem:[#allocation6] sm:$0xff] }
  0x51   :  { %550 = vlog2.f32 %v198_v30  ;;  %v386_v40 = vmul.f32 %v370_v35, %v338_v26  ;;  %v337_v41 = vadd.f32 %v233_v28, %v113_v23  ;;  %v212_v44 = vmul.f32 %v541_v11, %v211_v50  ;;  %v367_v11 = vld [vmem:[#allocation9 + $0x10] sm:$0xff]  ;;  %v413_v28 = vld [vmem:[#allocation3] sm:$0xff] }
  0x52   :  { %552 = vpow2.f32 %v157_v5  ;;  %v224_v43 = vsel %vm918_vm12, %v221_v29, %v218_v14  ;;  %v202_v45 = vadd.f32 1.0, %v201_v46  ;;  %vm925_vm13 = vcmp.lt.f32.partialorder %v213_v34, 0.0004427343  ;;  %v350_v5 = vld [vmem:[#allocation6 + $0x8] sm:$0xff] }
  0x53   :  { %423 = vmatpush.xpose.msra.mxu0 %v404_v25  ;;  %v204_v49 = vand.u32 2147483647, %v545_v36  ;;  %v402_v0 = vadd.f32 %v386_v40, %v354_v39  ;;  %v385_v12 = vmul.f32 %v369_v42, %v337_v41  ;;  %v336_v19 = vadd.f32 %v224_v43, %v112_v37  ;;  %v365_v25 = vld [vmem:[#allocation9] sm:$0xff] }
  0x54   :  { %v549_v48 = vpop.eup %548  ;;  %v111_v32 = vmax.f32 %v863_v63, 0.0  ;;  %v203_v59 = vmul.f32 %v545_v36, %v202_v45  ;;  %v110_v63 = vmax.f32 %v869_v47, 0.0  ;;  %v109_v58 = vmax.f32 %v884_v18, 0.0  ;;  %v441_v18 = vld [vmem:[%s957_s5] sm:$0x1] }
  0x55   :  { %v209_v52 = vmul.f32 0.6931472, %v549_v48  ;;  %vm932_vm14 = vcmp.lt.f32.partialorder %v204_v49, 0.0004427343  ;;  %v401_v3 = vadd.f32 %v385_v12, %v353_v54  ;;  %v384_v8 = vmul.f32 %v368_v55, %v336_v19  ;;  %v440_v48 = vld [vmem:[%s956_s4] sm:$0x1] }
  0x56   :  { %v443_v29 = vand.u32 2147483647, %v441_v18  ;;  %v442_v39 = vmax.f32 %v441_v18, 0.0 }
  0x57   :  { %424 = vmatpush.xpose.msra.mxu0 %v403_v10  ;;  %v551_v53 = vpop.eup %550  ;;  %v215_v56 = vsel %vm925_vm13, %v212_v44, %v209_v52  ;;  %v400_v17 = vadd.f32 %v384_v8, %v352_v4  ;;  %v457_v44 = vld [vmem:[%s958_s6] sm:$0x1] }
  0x58   :  { %v553_v60 = vpop.eup %552  ;;  %v200_v2 = vmul.f32 0.6931472, %v551_v53  ;;  %v335_v7 = vadd.f32 %v215_v56, %v111_v32  ;;  %v444_v50 = vsub.f32 0.0, %v443_v29 }
  0x59   :  { %v189_v61 = vadd.f32 1.0, %v553_v60  ;;  %v192_v62 = vmul.f32 -0.5, %v553_v60  ;;  %v195_v16 = vand.u32 2147483647, %v553_v60 }
  0x5a   :  { %v206_v13 = vsel %vm932_vm14, %v203_v59, %v200_v2  ;;  %v383_v31 = vmul.f32 %v367_v11, %v335_v7  ;;  %v445_v30 = vmul.f32 1.442695, %v444_v50 }
  0x5b   :  { %425 = vmatpush.xpose.msra.mxu0 %v402_v0  ;;  %554 = vlog2.f32 %v189_v61  ;;  %v193_v15 = vadd.f32 1.0, %v192_v62  ;;  %v334_v1 = vadd.f32 %v206_v13, %v110_v63  ;;  %vm196_vm15 = vcmp.lt.f32.partialorder %v195_v16, 0.0004427343 }
  0x5c   :  { %v399_v47 = vadd.f32 %v383_v31, %v351_v9  ;;  %556 = vpow2.f32 %v445_v30 }
  0x5d   :  { %v194_v21 = vmul.f32 %v553_v60, %v193_v15  ;;  %v382_v23 = vmul.f32 %v366_v20, %v334_v1 }
  0x5f   :  { %426 = vmatpush.xpose.msra.mxu0 %v401_v3  ;;  %v398_v26 = vadd.f32 %v382_v23, %v350_v5 }
  0x61   :  { %v555_v22 = vpop.eup %554 }
  0x62   :  { %v191_v24 = vmul.f32 0.6931472, %v555_v22  ;;  %v557_v14 = vpop.eup %556 }
  0x63   :  { %427 = vmatpush.xpose.msra.mxu0 %v400_v17  ;;  %v447_v6 = vadd.f32 1.0, %v557_v14  ;;  %v450_v34 = vmul.f32 -0.5, %v557_v14  ;;  %v453_v10 = vand.u32 2147483647, %v557_v14 }
  0x64   :  { %v197_v36 = vsel %vm196_vm15, %v194_v21, %v191_v24 }
  0x65   :  { %v333_v57 = vadd.f32 %v197_v36, %v109_v58  ;;  %558 = vlog2.f32 %v447_v6  ;;  %v451_v37 = vadd.f32 1.0, %v450_v34  ;;  %vm454_vm0 = vcmp.lt.f32.partialorder %v453_v10, 0.0004427343 }
  0x67   :  { %428 = vmatpush.xpose.msra.mxu0 %v399_v47  ;;  %v381_v38 = vmul.f32 %v365_v25, %v333_v57  ;;  %v452_v41 = vmul.f32 %v557_v14, %v451_v37 }
  0x69   :  { %v397_v35 = vadd.f32 %v381_v38, %v349_v27 }
  0x6b   :  { %429 = vmatpush.xpose.msra.mxu0 %v398_v26  ;;  %v559_v46 = vpop.eup %558 }
  0x6c   :  { %v449_v40 = vmul.f32 0.6931472, %v559_v46 }
  0x6e   :  { %v455_v42 = vsel %vm454_vm0, %v452_v41, %v449_v40 }
  0x6f   :  { %430 = vmatpush.xpose.msra.mxu0 %v397_v35  ;;  %v456_v43 = vadd.f32 %v455_v42, %v442_v39 }
  0x71   :  { %v458_v45 = vmul.f32 %v457_v44, %v456_v43 }
  0x72   :  { %431 = vmatmul.f32.vlgmr.msra.gmra.mxu0 %v413_v28 }
  0x73   :  { %v459_v51 = vadd.f32 %v458_v45, %v440_v48 }
  0x75   :  { %v462_v49 = vperm.slane %v459_v51, 0 }
  0xef   :  { %v432_v52 = vpop.f32.mrf.mxu0 }
  0xf0   :  { %v464_v0 = vadd.f32 %v462_v49, %v432_v52 }
  0xf2   :  { %465 = vst [vmem:[#allocation11] sm:$0xff] %v464_v0 }
  0xf3   :  { %476 = dma.vmem_to_hbm [thread:$0]  %s472_s25, 128, %s474_s28, [#allocation5]  }
  0xf4   :  { %686 = dma.done.wait [#allocation5], 128  }
  0xf5   :  { %687 = vsyncadd [#allocation5], 4294967168 }
  0xf6   :  { %481 = vsyncpa [#allocation4], 1 }
  0xf7   :  { %482 = vsyncpa [#allocation7], 1 }
  0xf8   :  { %483 = vsyncpa [#allocation10], 1 }
  0xf9   :  { %484 = vsyncpa [#allocation5], 1 }

</bundles_post_ra>
